<compile_context>
chip_gen: v7x
topology: tpu7x:2x2x1
jax: 0.10.0
libtpu: 0.0.40
codegen_flags: <defaults>
</compile_context>

<pallas_src>
from functools import partial

import jax
import jax.numpy as jnp
from jax import lax
from jax.experimental import pallas as pl
from jax.experimental.pallas import tpu as pltpu


# ------------------------------ fused kernel ------------------------------

def _cfgan_kernel(x_ref,
                  stem_w_ref, stem_b_ref, wqkv_ref, wa_ref, ba_ref,
                  fc_w_ref, fc_b_ref,
                  enc_w_ref, enc_b_ref, dec_w_ref, dec_b_ref,
                  logits_ref, cf_ref, exp_ref):
    """Whole CFGAN forward for a TB-element batch tile (grid axis 0 = batch/TB).

    x_ref block: (TB, C, L) in PyTorch NCL layout.  All intermediates stay in
    VMEM / vregs; only logits, cf_ecg and explainable_ecg are written back,
    each as a single lane-dense per-tile slab.
    """
    tb, c_in, seq = x_ref.shape
    d_attn = wqkv_ref.shape[1] // 3
    bf16 = jnp.bfloat16

    x_cl = x_ref[...]                                        # (TB, C, L) f32
    # Single NCL -> channels-last flip per tile; every matmul below then runs
    # with M = TB*L rows (fills MXU sublanes instead of 16-row passes).
    x_lc = x_cl.transpose(0, 2, 1).reshape(tb * seq, c_in)   # (TB*L, C) f32
    x16 = x_lc.astype(bf16)

    def sar18(inp16, compute_logits):
        """Synthetic self_attention_resnet18 on a (TB*L, C) bf16 activation."""
        # pointwise-conv stem (channels on the lane axis), bf16 MXU / f32 acc
        h = jnp.dot(inp16, stem_w_ref[...],
                    preferred_element_type=jnp.float32)
        h = jnp.maximum(h + stem_b_ref[...], 0.0)            # (TB*L, H) f32
        # fused q/k/v projection: one MXU matmul, 3*D output lanes
        qkv = jnp.dot(h.astype(bf16), wqkv_ref[...],
                      preferred_element_type=jnp.float32)    # (TB*L, 3D)
        q = qkv[:, :d_attn].reshape(tb, seq, d_attn)         # 1/sqrt(d) folded
        k = qkv[:, d_attn:2 * d_attn].reshape(tb, seq, d_attn)
        v = qkv[:, 2 * d_attn:].reshape(tb, seq, d_attn)
        # per-element attention: batched einsum, no explicit k transpose
        s = jnp.einsum('bqd,bkd->bqk', q.astype(bf16), k.astype(bf16),
                       preferred_element_type=jnp.float32)   # (TB, L, L) f32
        s = s - jnp.max(s, axis=-1, keepdims=True)
        p = jnp.exp(s)                                        # f32 on EUP/VPU
        p = p * pl.reciprocal(jnp.sum(p, axis=-1, keepdims=True), approx=True)
        o = jnp.einsum('bqk,bkd->bqd', p.astype(bf16), v.astype(bf16),
                       preferred_element_type=jnp.float32)   # (TB, L, D) f32
        o2d = o.reshape(tb * seq, d_attn)
        # attention-map head: VPU multiply + lane reduction (a 1-output-lane
        # matmul would waste 127/255 MXU columns)
        a = jnp.sum(o2d * wa_ref[...], axis=-1, keepdims=True)   # (TB*L, 1)
        amap = jax.nn.sigmoid(a + ba_ref[...])                   # (TB*L, 1)
        logits = None
        if compute_logits:
            # global-average-pool classifier head (per batch element)
            feat = jnp.mean(o, axis=1)                           # (TB, D)
            logits = jnp.dot(feat.astype(bf16), fc_w_ref[...],
                             preferred_element_type=jnp.float32) + fc_b_ref[...]
        return logits, amap

    # 1) sar18(x) -> attention map only (its logits are discarded by forward)
    _, amap = sar18(x16, compute_logits=False)

    # 2) unet(x, amap): encoder -> attention modulate -> tanh decoder
    he = jnp.dot(x16, enc_w_ref[...], preferred_element_type=jnp.float32)
    he = jnp.maximum(he + enc_b_ref[...], 0.0)               # (TB*L, H) f32
    hm = he * amap                                            # (TB*L,H)*(TB*L,1)
    exp_lc = jnp.tanh(
        jnp.dot(hm.astype(bf16), dec_w_ref[...],
                preferred_element_type=jnp.float32) + dec_b_ref[...])  # (TB*L,C)

    # 3) counterfactual ECG and second (classification) sar18 pass, all f32
    cf_lc = x_lc + exp_lc                                     # channels-last
    logits, _ = sar18(cf_lc.astype(bf16), compute_logits=True)

    # Back to NCL and store as lane-dense (TB, C*L) / (TB, K) per-tile slabs.
    exp_cl = exp_lc.reshape(tb, seq, c_in).transpose(0, 2, 1)   # (TB, C, L)
    cf_cl = x_cl + exp_cl                                       # NCL residual
    logits_ref[0] = logits.astype(logits_ref.dtype)             # (TB, K)
    cf_ref[0] = cf_cl.reshape(tb, c_in * seq).astype(cf_ref.dtype)
    exp_ref[0] = exp_cl.reshape(tb, c_in * seq).astype(exp_ref.dtype)


# --------------------------------- wrapper ---------------------------------

def _resident(shape):
    """Full-array block with a constant index_map -> stays VMEM-resident."""
    zeros = (0,) * len(shape)
    return pl.BlockSpec(shape, lambda b, zeros=zeros: zeros)


def _pick_batch_tile(n):
    """Largest divisor of n (<= 8), preferring >= 2 grid steps (v7x: 2 TCs)."""
    candidates = [d for d in range(min(n, 8), 0, -1) if n % d == 0]
    for d in candidates:
        if n // d >= 2:
            return d
    return candidates[0]


@partial(jax.jit, static_argnames=("return_exp",))
def cfgan_forward(x, params, return_exp=False):
    """CFGAN.forward: returns (outputs, cf_ecg), or explainable_ecg."""
    N, C, L = x.shape
    sp, up = params["sar18"], params["unet"]
    H = sp["stem_w"].shape[1]
    d_attn = sp["wqkv"].shape[1] // 3
    num_classes = sp["fc_w"].shape[1]
    bf16 = jnp.bfloat16

    tb = _pick_batch_tile(N)       # static at trace time
    g = N // tb

    # Outputs are laid out as per-tile slabs (grid dim leading, last two dims
    # full-extent -> no masked per-element stores); reshaped back to NCL /
    # (N, K) below with free row-major reshapes.
    out_shapes = (
        jax.ShapeDtypeStruct((g, tb, num_classes), x.dtype),   # logits
        jax.ShapeDtypeStruct((g, tb, C * L), x.dtype),         # cf_ecg
        jax.ShapeDtypeStruct((g, tb, C * L), x.dtype),         # explainable
    )
    logits3, cf_flat, exp_flat = pl.pallas_call(
        _cfgan_kernel,
        out_shape=out_shapes,
        grid=(g,),
        in_specs=[
            pl.BlockSpec((tb, C, L), lambda b: (b, 0, 0)),     # x (NCL tile)
            _resident((C, H)), _resident((1, H)),              # sar18 stem
            _resident((H, 3 * d_attn)),                        # fused wq|wk|wv
            _resident((1, d_attn)), _resident((1, 1)),         # attn-map head
            _resident((d_attn, num_classes)),                  # classifier
            _resident((1, num_classes)),
            _resident((C, H)), _resident((1, H)),              # unet encoder
            _resident((H, C)), _resident((1, C)),              # unet decoder
        ],
        out_specs=(
            pl.BlockSpec((1, tb, num_classes), lambda b: (b, 0, 0)),
            pl.BlockSpec((1, tb, C * L), lambda b: (b, 0, 0)),
            pl.BlockSpec((1, tb, C * L), lambda b: (b, 0, 0)),
        ),
        compiler_params=pltpu.CompilerParams(
            dimension_semantics=("parallel",)),                # 2 TCs on v7x
        # TODO(synk): set vmem_limit_bytes per generation once tiles grow
        # (flash KV tiling / real weights); the toy footprint fits defaults.
    )(x,
      # MXU-facing weights in bf16 (f32 accumulation inside the kernel);
      # biases / VPU-path params stay f32.
      sp["stem_w"].astype(bf16), sp["stem_b"], sp["wqkv"].astype(bf16),
      sp["wa"], sp["ba"],
      sp["fc_w"].astype(bf16), sp["fc_b"],
      up["enc_w"].astype(bf16), up["enc_b"],
      up["dec_w"].astype(bf16), up["dec_b"])

    explainable_ecg = exp_flat.reshape(N, C, L)
    if return_exp:
        return explainable_ecg
    outputs = logits3.reshape(N, num_classes)
    cf_ecg = cf_flat.reshape(N, C, L)
    return outputs, cf_ecg


# ------------------------------- param setup -------------------------------

def init_params(key, c_in, hidden, d_attn, num_classes):
    ks = jax.random.split(key, 8)
    s = 0.1
    wq = s * jax.random.normal(ks[1], (hidden, d_attn), jnp.float32)
    wk = s * jax.random.normal(ks[2], (hidden, d_attn), jnp.float32)
    wv = s * jax.random.normal(ks[3], (hidden, d_attn), jnp.float32)
    # fold the attention 1/sqrt(d) scale into wq, and fuse q|k|v into one matmul
    wqkv = jnp.concatenate(
        [wq * (1.0 / jnp.sqrt(jnp.float32(d_attn))), wk, wv], axis=1)
    sar18 = {
        "stem_w": s * jax.random.normal(ks[0], (c_in, hidden), jnp.float32),
        "stem_b": jnp.zeros((1, hidden), jnp.float32),
        "wqkv": wqkv,                                          # (H, 3*D)
        "wa": s * jax.random.normal(ks[4], (1, d_attn), jnp.float32),
        "ba": jnp.zeros((1, 1), jnp.float32),
        "fc_w": s * jax.random.normal(ks[5], (d_attn, num_classes), jnp.float32),
        "fc_b": jnp.zeros((1, num_classes), jnp.float32),
    }
    unet = {
        "enc_w": s * jax.random.normal(ks[6], (c_in, hidden), jnp.float32),
        "enc_b": jnp.zeros((1, hidden), jnp.float32),
        "dec_w": s * jax.random.normal(ks[7], (hidden, c_in), jnp.float32),
        "dec_b": jnp.zeros((1, c_in), jnp.float32),
    }
    # freeze_sar18 only flips requires_grad; forward is identical.
    return {"sar18": sar18, "unet": unet}


# ----------------------------------- main -----------------------------------

if __name__ == "__main__":
    N, C_IN, L = 4, 4, 16
    HIDDEN, D_ATTN, NUM_CLASSES = 32, 32, 8

    key = jax.random.PRNGKey(0)
    k_x, k_p = jax.random.split(key)
    x = jax.random.normal(k_x, (N, C_IN, L), jnp.float32)     # NCL ECG batch
    params = init_params(k_p, C_IN, HIDDEN, D_ATTN, NUM_CLASSES)

    outputs, cf_ecg = cfgan_forward(x, params)
    jax.block_until_ready((outputs, cf_ecg))

    assert outputs.shape == (N, NUM_CLASSES)
    assert cf_ecg.shape == (N, C_IN, L)
    assert bool(jnp.all(jnp.isfinite(outputs))) and bool(jnp.all(jnp.isfinite(cf_ecg)))
    print("KERNEL_OK")
</pallas_src>

<mosaic_0001>
module attributes {stable_mosaic.version = 11 : i64} {
  func.func @_cfgan_kernel(%arg0: i32, %arg1: memref<2x4x16xf32, #tpu.memory_space<vmem>>, %arg2: memref<4x32xbf16, #tpu.memory_space<vmem>>, %arg3: memref<1x32xf32, #tpu.memory_space<vmem>>, %arg4: memref<32x96xbf16, #tpu.memory_space<vmem>>, %arg5: memref<1x32xf32, #tpu.memory_space<vmem>>, %arg6: memref<1x1xf32, #tpu.memory_space<vmem>>, %arg7: memref<32x8xbf16, #tpu.memory_space<vmem>>, %arg8: memref<1x8xf32, #tpu.memory_space<vmem>>, %arg9: memref<4x32xbf16, #tpu.memory_space<vmem>>, %arg10: memref<1x32xf32, #tpu.memory_space<vmem>>, %arg11: memref<32x4xbf16, #tpu.memory_space<vmem>>, %arg12: memref<1x4xf32, #tpu.memory_space<vmem>>, %arg13: memref<1x2x8xf32, #tpu.memory_space<vmem>>, %arg14: memref<1x2x64xf32, #tpu.memory_space<vmem>>, %arg15: memref<1x2x64xf32, #tpu.memory_space<vmem>>) attributes {dimension_semantics = [#tpu.dimension_semantics<parallel>], iteration_bounds = array<i64: 2>, scalar_prefetch = 0 : i64, scratch_operands = 0 : i64, tpu.core_type = #tpu.core_type<tc>, window_params = [{transform_indices = @transform_0, window_bounds = array<i64: 2, 4, 16>}, {pipeline_mode = #tpu.pipeline_mode<synchronous>, transform_indices = @transform_1, window_bounds = array<i64: 4, 32>}, {pipeline_mode = #tpu.pipeline_mode<synchronous>, transform_indices = @transform_2, window_bounds = array<i64: 1, 32>}, {pipeline_mode = #tpu.pipeline_mode<synchronous>, transform_indices = @transform_3, window_bounds = array<i64: 32, 96>}, {pipeline_mode = #tpu.pipeline_mode<synchronous>, transform_indices = @transform_4, window_bounds = array<i64: 1, 32>}, {pipeline_mode = #tpu.pipeline_mode<synchronous>, transform_indices = @transform_5, window_bounds = array<i64: 1, 1>}, {pipeline_mode = #tpu.pipeline_mode<synchronous>, transform_indices = @transform_6, window_bounds = array<i64: 32, 8>}, {pipeline_mode = #tpu.pipeline_mode<synchronous>, transform_indices = @transform_7, window_bounds = array<i64: 1, 8>}, {pipeline_mode = #tpu.pipeline_mode<synchronous>, transform_indices = @transform_8, window_bounds = array<i64: 4, 32>}, {pipeline_mode = #tpu.pipeline_mode<synchronous>, transform_indices = @transform_9, window_bounds = array<i64: 1, 32>}, {pipeline_mode = #tpu.pipeline_mode<synchronous>, transform_indices = @transform_10, window_bounds = array<i64: 32, 4>}, {pipeline_mode = #tpu.pipeline_mode<synchronous>, transform_indices = @transform_11, window_bounds = array<i64: 1, 4>}, {transform_indices = @transform_12, window_bounds = array<i64: 1, 2, 8>}, {transform_indices = @transform_13, window_bounds = array<i64: 1, 2, 64>}, {transform_indices = @transform_14, window_bounds = array<i64: 1, 2, 64>}]} {
    %c0 = arith.constant 0 : index
    %c0_0 = arith.constant 0 : index
    %c0_1 = arith.constant 0 : index
    %0 = vector.load %arg1[%c0, %c0_0, %c0_1] : memref<2x4x16xf32, #tpu.memory_space<vmem>>, vector<2x4x16xf32>
    %1 = tpu.transpose %0, [0, 2, 1] : vector<2x4x16xf32> -> vector<2x16x4xf32>
    %2 = vector.shape_cast %1 : vector<2x16x4xf32> to vector<32x4xf32>
    %3 = arith.truncf %2 : vector<32x4xf32> to vector<32x4xbf16>
    %c0_2 = arith.constant 0 : index
    %c0_3 = arith.constant 0 : index
    %4 = vector.load %arg2[%c0_2, %c0_3] : memref<4x32xbf16, #tpu.memory_space<vmem>>, vector<4x32xbf16>
    %cst = arith.constant dense<0.000000e+00> : vector<32x32xf32>
    %5 = tpu.matmul %3, %4, %cst {dimension_numbers = #tpu.dot_dimension_numbers<[1], [0], [0], [1], [0, 0, 1, 1], [], []>} : vector<32x4xbf16>, vector<4x32xbf16>, vector<32x32xf32> -> vector<32x32xf32>
    %c0_4 = arith.constant 0 : index
    %c0_5 = arith.constant 0 : index
    %6 = vector.load %arg3[%c0_4, %c0_5] : memref<1x32xf32, #tpu.memory_space<vmem>>, vector<1x32xf32>
    %7 = vector.broadcast %6 : vector<1x32xf32> to vector<32x32xf32>
    %8 = arith.addf %5, %7 : vector<32x32xf32>
    %cst_6 = arith.constant 0.000000e+00 : f32
    %9 = vector.broadcast %cst_6 : f32 to vector<32x32xf32>
    %10 = arith.maximumf %8, %9 : vector<32x32xf32>
    %11 = arith.truncf %10 : vector<32x32xf32> to vector<32x32xbf16>
    %c0_7 = arith.constant 0 : index
    %c0_8 = arith.constant 0 : index
    %12 = vector.load %arg4[%c0_7, %c0_8] : memref<32x96xbf16, #tpu.memory_space<vmem>>, vector<32x96xbf16>
    %cst_9 = arith.constant dense<0.000000e+00> : vector<32x96xf32>
    %13 = tpu.matmul %11, %12, %cst_9 {dimension_numbers = #tpu.dot_dimension_numbers<[1], [0], [0], [1], [0, 0, 1, 1], [], []>} : vector<32x32xbf16>, vector<32x96xbf16>, vector<32x96xf32> -> vector<32x96xf32>
    %14 = vector.extract_strided_slice %13 {offsets = [0, 0], sizes = [32, 32], strides = [1, 1]} : vector<32x96xf32> to vector<32x32xf32>
    %15 = vector.shape_cast %14 : vector<32x32xf32> to vector<2x16x32xf32>
    %16 = vector.extract_strided_slice %13 {offsets = [0, 32], sizes = [32, 32], strides = [1, 1]} : vector<32x96xf32> to vector<32x32xf32>
    %17 = vector.shape_cast %16 : vector<32x32xf32> to vector<2x16x32xf32>
    %18 = vector.extract_strided_slice %13 {offsets = [0, 64], sizes = [32, 32], strides = [1, 1]} : vector<32x96xf32> to vector<32x32xf32>
    %19 = vector.shape_cast %18 : vector<32x32xf32> to vector<2x16x32xf32>
    %20 = arith.truncf %15 : vector<2x16x32xf32> to vector<2x16x32xbf16>
    %21 = arith.truncf %17 : vector<2x16x32xf32> to vector<2x16x32xbf16>
    "tpu.trace_start"() <{level = 10 : i32, message = "bqd,bkd->bqk"}> : () -> ()
    %cst_10 = arith.constant dense<0.000000e+00> : vector<2x16x16xf32>
    %22 = tpu.matmul %20, %21, %cst_10 {dimension_numbers = #tpu.dot_dimension_numbers<[2], [2], [1], [1], [0, 0, 0, 1, 1, 1], [0], [0]>} : vector<2x16x32xbf16>, vector<2x16x32xbf16>, vector<2x16x16xf32> -> vector<2x16x16xf32>
    "tpu.trace_stop"() : () -> ()
    %cst_11 = arith.constant dense<0xFF800000> : vector<2x16xf32>
    %23 = vector.multi_reduction <maximumf>, %22, %cst_11 [2] : vector<2x16x16xf32> to vector<2x16xf32>
    %24 = vector.shape_cast %23 : vector<2x16xf32> to vector<2x16x1xf32>
    %25 = vector.broadcast %24 : vector<2x16x1xf32> to vector<2x16x16xf32>
    %26 = arith.subf %22, %25 : vector<2x16x16xf32>
    %27 = math.exp %26 : vector<2x16x16xf32>
    %cst_12 = arith.constant dense<0.000000e+00> : vector<2x16xf32>
    %28 = vector.multi_reduction <add>, %27, %cst_12 [2] : vector<2x16x16xf32> to vector<2x16xf32>
    %29 = vector.shape_cast %28 : vector<2x16xf32> to vector<2x16x1xf32>
    %30 = tpu.reciprocal %29 {approx = true} : vector<2x16x1xf32> -> vector<2x16x1xf32>
    %31 = vector.broadcast %30 : vector<2x16x1xf32> to vector<2x16x16xf32>
    %32 = arith.mulf %27, %31 : vector<2x16x16xf32>
    %33 = arith.truncf %32 : vector<2x16x16xf32> to vector<2x16x16xbf16>
    %34 = arith.truncf %19 : vector<2x16x32xf32> to vector<2x16x32xbf16>
    "tpu.trace_start"() <{level = 10 : i32, message = "bqk,bkd->bqd"}> : () -> ()
    %cst_13 = arith.constant dense<0.000000e+00> : vector<2x16x32xf32>
    %35 = tpu.matmul %33, %34, %cst_13 {dimension_numbers = #tpu.dot_dimension_numbers<[2], [1], [1], [2], [0, 0, 0, 1, 1, 2], [0], [0]>} : vector<2x16x16xbf16>, vector<2x16x32xbf16>, vector<2x16x32xf32> -> vector<2x16x32xf32>
    "tpu.trace_stop"() : () -> ()
    %36 = vector.shape_cast %35 : vector<2x16x32xf32> to vector<32x32xf32>
    %c0_14 = arith.constant 0 : index
    %c0_15 = arith.constant 0 : index
    %37 = vector.load %arg5[%c0_14, %c0_15] : memref<1x32xf32, #tpu.memory_space<vmem>>, vector<1x32xf32>
    %38 = vector.broadcast %37 : vector<1x32xf32> to vector<32x32xf32>
    %39 = arith.mulf %36, %38 : vector<32x32xf32>
    %cst_16 = arith.constant dense<0.000000e+00> : vector<32xf32>
    %40 = vector.multi_reduction <add>, %39, %cst_16 [1] : vector<32x32xf32> to vector<32xf32>
    %41 = vector.shape_cast %40 : vector<32xf32> to vector<32x1xf32>
    %c0_17 = arith.constant 0 : index
    %c0_18 = arith.constant 0 : index
    %42 = vector.load %arg6[%c0_17, %c0_18] : memref<1x1xf32, #tpu.memory_space<vmem>>, vector<1x1xf32>
    %43 = vector.broadcast %42 : vector<1x1xf32> to vector<32x1xf32>
    %44 = arith.addf %41, %43 : vector<32x1xf32>
    %45 = arith.negf %44 : vector<32x1xf32>
    %46 = math.exp %45 : vector<32x1xf32>
    %cst_19 = arith.constant 1.000000e+00 : f32
    %47 = vector.broadcast %cst_19 : f32 to vector<32x1xf32>
    %48 = arith.addf %47, %46 : vector<32x1xf32>
    %49 = arith.divf %47, %48 : vector<32x1xf32>
    %c0_20 = arith.constant 0 : index
    %c0_21 = arith.constant 0 : index
    %50 = vector.load %arg9[%c0_20, %c0_21] : memref<4x32xbf16, #tpu.memory_space<vmem>>, vector<4x32xbf16>
    %cst_22 = arith.constant dense<0.000000e+00> : vector<32x32xf32>
    %51 = tpu.matmul %3, %50, %cst_22 {dimension_numbers = #tpu.dot_dimension_numbers<[1], [0], [0], [1], [0, 0, 1, 1], [], []>} : vector<32x4xbf16>, vector<4x32xbf16>, vector<32x32xf32> -> vector<32x32xf32>
    %c0_23 = arith.constant 0 : index
    %c0_24 = arith.constant 0 : index
    %52 = vector.load %arg10[%c0_23, %c0_24] : memref<1x32xf32, #tpu.memory_space<vmem>>, vector<1x32xf32>
    %53 = vector.broadcast %52 : vector<1x32xf32> to vector<32x32xf32>
    %54 = arith.addf %51, %53 : vector<32x32xf32>
    %cst_25 = arith.constant 0.000000e+00 : f32
    %55 = vector.broadcast %cst_25 : f32 to vector<32x32xf32>
    %56 = arith.maximumf %54, %55 : vector<32x32xf32>
    %57 = vector.broadcast %49 : vector<32x1xf32> to vector<32x32xf32>
    %58 = arith.mulf %56, %57 : vector<32x32xf32>
    %59 = arith.truncf %58 : vector<32x32xf32> to vector<32x32xbf16>
    %c0_26 = arith.constant 0 : index
    %c0_27 = arith.constant 0 : index
    %60 = vector.load %arg11[%c0_26, %c0_27] : memref<32x4xbf16, #tpu.memory_space<vmem>>, vector<32x4xbf16>
    %cst_28 = arith.constant dense<0.000000e+00> : vector<32x4xf32>
    %61 = tpu.matmul %59, %60, %cst_28 {dimension_numbers = #tpu.dot_dimension_numbers<[1], [0], [0], [1], [0, 0, 1, 1], [], []>} : vector<32x32xbf16>, vector<32x4xbf16>, vector<32x4xf32> -> vector<32x4xf32>
    %c0_29 = arith.constant 0 : index
    %c0_30 = arith.constant 0 : index
    %62 = vector.load %arg12[%c0_29, %c0_30] : memref<1x4xf32, #tpu.memory_space<vmem>>, vector<1x4xf32>
    %63 = vector.broadcast %62 : vector<1x4xf32> to vector<32x4xf32>
    %64 = arith.addf %61, %63 : vector<32x4xf32>
    %65 = math.tanh %64 : vector<32x4xf32>
    %66 = arith.addf %2, %65 : vector<32x4xf32>
    %67 = arith.truncf %66 : vector<32x4xf32> to vector<32x4xbf16>
    %c0_31 = arith.constant 0 : index
    %c0_32 = arith.constant 0 : index
    %68 = vector.load %arg2[%c0_31, %c0_32] : memref<4x32xbf16, #tpu.memory_space<vmem>>, vector<4x32xbf16>
    %cst_33 = arith.constant dense<0.000000e+00> : vector<32x32xf32>
    %69 = tpu.matmul %67, %68, %cst_33 {dimension_numbers = #tpu.dot_dimension_numbers<[1], [0], [0], [1], [0, 0, 1, 1], [], []>} : vector<32x4xbf16>, vector<4x32xbf16>, vector<32x32xf32> -> vector<32x32xf32>
    %c0_34 = arith.constant 0 : index
    %c0_35 = arith.constant 0 : index
    %70 = vector.load %arg3[%c0_34, %c0_35] : memref<1x32xf32, #tpu.memory_space<vmem>>, vector<1x32xf32>
    %71 = vector.broadcast %70 : vector<1x32xf32> to vector<32x32xf32>
    %72 = arith.addf %69, %71 : vector<32x32xf32>
    %cst_36 = arith.constant 0.000000e+00 : f32
    %73 = vector.broadcast %cst_36 : f32 to vector<32x32xf32>
    %74 = arith.maximumf %72, %73 : vector<32x32xf32>
    %75 = arith.truncf %74 : vector<32x32xf32> to vector<32x32xbf16>
    %c0_37 = arith.constant 0 : index
    %c0_38 = arith.constant 0 : index
    %76 = vector.load %arg4[%c0_37, %c0_38] : memref<32x96xbf16, #tpu.memory_space<vmem>>, vector<32x96xbf16>
    %cst_39 = arith.constant dense<0.000000e+00> : vector<32x96xf32>
    %77 = tpu.matmul %75, %76, %cst_39 {dimension_numbers = #tpu.dot_dimension_numbers<[1], [0], [0], [1], [0, 0, 1, 1], [], []>} : vector<32x32xbf16>, vector<32x96xbf16>, vector<32x96xf32> -> vector<32x96xf32>
    %78 = vector.extract_strided_slice %77 {offsets = [0, 0], sizes = [32, 32], strides = [1, 1]} : vector<32x96xf32> to vector<32x32xf32>
    %79 = vector.shape_cast %78 : vector<32x32xf32> to vector<2x16x32xf32>
    %80 = vector.extract_strided_slice %77 {offsets = [0, 32], sizes = [32, 32], strides = [1, 1]} : vector<32x96xf32> to vector<32x32xf32>
    %81 = vector.shape_cast %80 : vector<32x32xf32> to vector<2x16x32xf32>
    %82 = vector.extract_strided_slice %77 {offsets = [0, 64], sizes = [32, 32], strides = [1, 1]} : vector<32x96xf32> to vector<32x32xf32>
    %83 = vector.shape_cast %82 : vector<32x32xf32> to vector<2x16x32xf32>
    %84 = arith.truncf %79 : vector<2x16x32xf32> to vector<2x16x32xbf16>
    %85 = arith.truncf %81 : vector<2x16x32xf32> to vector<2x16x32xbf16>
    "tpu.trace_start"() <{level = 10 : i32, message = "bqd,bkd->bqk"}> : () -> ()
    %cst_40 = arith.constant dense<0.000000e+00> : vector<2x16x16xf32>
    %86 = tpu.matmul %84, %85, %cst_40 {dimension_numbers = #tpu.dot_dimension_numbers<[2], [2], [1], [1], [0, 0, 0, 1, 1, 1], [0], [0]>} : vector<2x16x32xbf16>, vector<2x16x32xbf16>, vector<2x16x16xf32> -> vector<2x16x16xf32>
    "tpu.trace_stop"() : () -> ()
    %cst_41 = arith.constant dense<0xFF800000> : vector<2x16xf32>
    %87 = vector.multi_reduction <maximumf>, %86, %cst_41 [2] : vector<2x16x16xf32> to vector<2x16xf32>
    %88 = vector.shape_cast %87 : vector<2x16xf32> to vector<2x16x1xf32>
    %89 = vector.broadcast %88 : vector<2x16x1xf32> to vector<2x16x16xf32>
    %90 = arith.subf %86, %89 : vector<2x16x16xf32>
    %91 = math.exp %90 : vector<2x16x16xf32>
    %cst_42 = arith.constant dense<0.000000e+00> : vector<2x16xf32>
    %92 = vector.multi_reduction <add>, %91, %cst_42 [2] : vector<2x16x16xf32> to vector<2x16xf32>
    %93 = vector.shape_cast %92 : vector<2x16xf32> to vector<2x16x1xf32>
    %94 = tpu.reciprocal %93 {approx = true} : vector<2x16x1xf32> -> vector<2x16x1xf32>
    %95 = vector.broadcast %94 : vector<2x16x1xf32> to vector<2x16x16xf32>
    %96 = arith.mulf %91, %95 : vector<2x16x16xf32>
    %97 = arith.truncf %96 : vector<2x16x16xf32> to vector<2x16x16xbf16>
    %98 = arith.truncf %83 : vector<2x16x32xf32> to vector<2x16x32xbf16>
    "tpu.trace_start"() <{level = 10 : i32, message = "bqk,bkd->bqd"}> : () -> ()
    %cst_43 = arith.constant dense<0.000000e+00> : vector<2x16x32xf32>
    %99 = tpu.matmul %97, %98, %cst_43 {dimension_numbers = #tpu.dot_dimension_numbers<[2], [1], [1], [2], [0, 0, 0, 1, 1, 2], [0], [0]>} : vector<2x16x16xbf16>, vector<2x16x32xbf16>, vector<2x16x32xf32> -> vector<2x16x32xf32>
    "tpu.trace_stop"() : () -> ()
    %cst_44 = arith.constant dense<0.000000e+00> : vector<2x32xf32>
    %100 = vector.multi_reduction <add>, %99, %cst_44 [1] : vector<2x16x32xf32> to vector<2x32xf32>
    %cst_45 = arith.constant 1.600000e+01 : f32
    %101 = vector.broadcast %cst_45 : f32 to vector<2x32xf32>
    %102 = arith.divf %100, %101 : vector<2x32xf32>
    %103 = arith.truncf %102 : vector<2x32xf32> to vector<2x32xbf16>
    %c0_46 = arith.constant 0 : index
    %c0_47 = arith.constant 0 : index
    %104 = vector.load %arg7[%c0_46, %c0_47] : memref<32x8xbf16, #tpu.memory_space<vmem>>, vector<32x8xbf16>
    %cst_48 = arith.constant dense<0.000000e+00> : vector<2x8xf32>
    %105 = tpu.matmul %103, %104, %cst_48 {dimension_numbers = #tpu.dot_dimension_numbers<[1], [0], [0], [1], [0, 0, 1, 1], [], []>} : vector<2x32xbf16>, vector<32x8xbf16>, vector<2x8xf32> -> vector<2x8xf32>
    %c0_49 = arith.constant 0 : index
    %c0_50 = arith.constant 0 : index
    %106 = vector.load %arg8[%c0_49, %c0_50] : memref<1x8xf32, #tpu.memory_space<vmem>>, vector<1x8xf32>
    %107 = vector.broadcast %106 : vector<1x8xf32> to vector<2x8xf32>
    %108 = arith.addf %105, %107 : vector<2x8xf32>
    %109 = vector.shape_cast %65 : vector<32x4xf32> to vector<2x16x4xf32>
    %110 = tpu.transpose %109, [0, 2, 1] : vector<2x16x4xf32> -> vector<2x4x16xf32>
    %111 = arith.addf %0, %110 : vector<2x4x16xf32>
    %c0_51 = arith.constant 0 : index
    %c0_52 = arith.constant 0 : index
    %c0_53 = arith.constant 0 : index
    %112 = vector.load %arg13[%c0_51, %c0_52, %c0_53] : memref<1x2x8xf32, #tpu.memory_space<vmem>>, vector<1x2x8xf32>
    %113 = vector.shape_cast %112 : vector<1x2x8xf32> to vector<2x8xf32>
    %114 = vector.shape_cast %108 : vector<2x8xf32> to vector<1x2x8xf32>
    tpu.vector_store %arg13[%c0_51, %c0_52, %c0_53], %114 {strides = array<i32>} : memref<1x2x8xf32, #tpu.memory_space<vmem>>, vector<1x2x8xf32>,
    %115 = vector.shape_cast %111 : vector<2x4x16xf32> to vector<2x64xf32>
    %c0_54 = arith.constant 0 : index
    %c0_55 = arith.constant 0 : index
    %c0_56 = arith.constant 0 : index
    %116 = vector.load %arg14[%c0_54, %c0_55, %c0_56] : memref<1x2x64xf32, #tpu.memory_space<vmem>>, vector<1x2x64xf32>
    %117 = vector.shape_cast %116 : vector<1x2x64xf32> to vector<2x64xf32>
    %118 = vector.shape_cast %115 : vector<2x64xf32> to vector<1x2x64xf32>
    tpu.vector_store %arg14[%c0_54, %c0_55, %c0_56], %118 {strides = array<i32>} : memref<1x2x64xf32, #tpu.memory_space<vmem>>, vector<1x2x64xf32>,
    %119 = vector.shape_cast %110 : vector<2x4x16xf32> to vector<2x64xf32>
    %c0_57 = arith.constant 0 : index
    %c0_58 = arith.constant 0 : index
    %c0_59 = arith.constant 0 : index
    %120 = vector.load %arg15[%c0_57, %c0_58, %c0_59] : memref<1x2x64xf32, #tpu.memory_space<vmem>>, vector<1x2x64xf32>
    %121 = vector.shape_cast %120 : vector<1x2x64xf32> to vector<2x64xf32>
    %122 = vector.shape_cast %119 : vector<2x64xf32> to vector<1x2x64xf32>
    tpu.vector_store %arg15[%c0_57, %c0_58, %c0_59], %122 {strides = array<i32>} : memref<1x2x64xf32, #tpu.memory_space<vmem>>, vector<1x2x64xf32>,
    return
  }
  func.func @transform_0(%arg0: i32) -> (i32, i32, i32) {
    %c0_i32 = arith.constant 0 : i32
    %c0_i32_0 = arith.constant 0 : i32
    %c0_i32_1 = arith.constant 0 : i32
    return %arg0, %c0_i32, %c0_i32_0 : i32, i32, i32
  }
  func.func @transform_1(%arg0: i32) -> (i32, i32) {
    %c0_i32 = arith.constant 0 : i32
    %c0_i32_0 = arith.constant 0 : i32
    %c0_i32_1 = arith.constant 0 : i32
    return %c0_i32, %c0_i32_0 : i32, i32
  }
  func.func @transform_2(%arg0: i32) -> (i32, i32) {
    %c0_i32 = arith.constant 0 : i32
    %c0_i32_0 = arith.constant 0 : i32
    %c0_i32_1 = arith.constant 0 : i32
    return %c0_i32, %c0_i32_0 : i32, i32
  }
  func.func @transform_3(%arg0: i32) -> (i32, i32) {
    %c0_i32 = arith.constant 0 : i32
    %c0_i32_0 = arith.constant 0 : i32
    %c0_i32_1 = arith.constant 0 : i32
    return %c0_i32, %c0_i32_0 : i32, i32
  }
  func.func @transform_4(%arg0: i32) -> (i32, i32) {
    %c0_i32 = arith.constant 0 : i32
    %c0_i32_0 = arith.constant 0 : i32
    %c0_i32_1 = arith.constant 0 : i32
    return %c0_i32, %c0_i32_0 : i32, i32
  }
  func.func @transform_5(%arg0: i32) -> (i32, i32) {
    %c0_i32 = arith.constant 0 : i32
    %c0_i32_0 = arith.constant 0 : i32
    %c0_i32_1 = arith.constant 0 : i32
    return %c0_i32, %c0_i32_0 : i32, i32
  }
  func.func @transform_6(%arg0: i32) -> (i32, i32) {
    %c0_i32 = arith.constant 0 : i32
    %c0_i32_0 = arith.constant 0 : i32
    %c0_i32_1 = arith.constant 0 : i32
    return %c0_i32, %c0_i32_0 : i32, i32
  }
  func.func @transform_7(%arg0: i32) -> (i32, i32) {
    %c0_i32 = arith.constant 0 : i32
    %c0_i32_0 = arith.constant 0 : i32
    %c0_i32_1 = arith.constant 0 : i32
    return %c0_i32, %c0_i32_0 : i32, i32
  }
  func.func @transform_8(%arg0: i32) -> (i32, i32) {
    %c0_i32 = arith.constant 0 : i32
    %c0_i32_0 = arith.constant 0 : i32
    %c0_i32_1 = arith.constant 0 : i32
    return %c0_i32, %c0_i32_0 : i32, i32
  }
  func.func @transform_9(%arg0: i32) -> (i32, i32) {
    %c0_i32 = arith.constant 0 : i32
    %c0_i32_0 = arith.constant 0 : i32
    %c0_i32_1 = arith.constant 0 : i32
    return %c0_i32, %c0_i32_0 : i32, i32
  }
  func.func @transform_10(%arg0: i32) -> (i32, i32) {
    %c0_i32 = arith.constant 0 : i32
    %c0_i32_0 = arith.constant 0 : i32
    %c0_i32_1 = arith.constant 0 : i32
    return %c0_i32, %c0_i32_0 : i32, i32
  }
  func.func @transform_11(%arg0: i32) -> (i32, i32) {
    %c0_i32 = arith.constant 0 : i32
    %c0_i32_0 = arith.constant 0 : i32
    %c0_i32_1 = arith.constant 0 : i32
    return %c0_i32, %c0_i32_0 : i32, i32
  }
  func.func @transform_12(%arg0: i32) -> (i32, i32, i32) {
    %c0_i32 = arith.constant 0 : i32
    %c0_i32_0 = arith.constant 0 : i32
    %c0_i32_1 = arith.constant 0 : i32
    return %arg0, %c0_i32, %c0_i32_0 : i32, i32, i32
  }
  func.func @transform_13(%arg0: i32) -> (i32, i32, i32) {
    %c0_i32 = arith.constant 0 : i32
    %c0_i32_0 = arith.constant 0 : i32
    %c0_i32_1 = arith.constant 0 : i32
    return %arg0, %c0_i32, %c0_i32_0 : i32, i32, i32
  }
  func.func @transform_14(%arg0: i32) -> (i32, i32, i32) {
    %c0_i32 = arith.constant 0 : i32
    %c0_i32_0 = arith.constant 0 : i32
    %c0_i32_1 = arith.constant 0 : i32
    return %arg0, %c0_i32, %c0_i32_0 : i32, i32, i32
  }
}

</mosaic_0001>

<bundles_post_ra>
// kernel: cfgan_forward.1
= control target key start
LH: loop header
LB: loop body
LE: loop exit
PB: predicated region body
PF: predicated region fallthrough
CT: control target
= control target key end

     0   :  { %s2841_s0 = inlined_call_operand.vmem [shape: f32[4,4,16], index: 0, kind: input, shape index: {}]   ;;  %s2842_s1 = inlined_call_operand.vmem [shape: bf16[4,32], index: 1, kind: input, shape index: {}]   ;;  %s2843_s2 = inlined_call_operand.vmem [shape: f32[1,32], index: 2, kind: input, shape index: {}]   ;;  %s2844_s3 = inlined_call_operand.vmem [shape: bf16[32,96], index: 3, kind: input, shape index: {}]   ;;  %s2845_s4 = inlined_call_operand.vmem [shape: f32[1,32], index: 4, kind: input, shape index: {}]   ;;  %s2846_s5 = inlined_call_operand.<no memory space> [shape: f32[1,1], index: 5, kind: input, shape index: {}]   ;;  %s2847_s6 = inlined_call_operand.vmem [shape: bf16[32,8], index: 6, kind: input, shape index: {}]   ;;  %s2848_s7 = inlined_call_operand.vmem [shape: f32[1,8], index: 7, kind: input, shape index: {}]   ;;  %s2849_s8 = inlined_call_operand.vmem [shape: bf16[4,32], index: 8, kind: input, shape index: {}]   ;;  %s2850_s9 = inlined_call_operand.vmem [shape: f32[1,32], index: 9, kind: input, shape index: {}]   ;;  %s2851_s10 = inlined_call_operand.vmem [shape: bf16[32,4], index: 10, kind: input, shape index: {}]   ;;  %s2852_s11 = inlined_call_operand.vmem [shape: f32[1,4], index: 11, kind: input, shape index: {}]   ;;  %s2853_s12 = inlined_call_operand.hbm [shape: f32[2,2,8], index: 12, kind: output, shape index: {0}]   ;;  %s2854_s13 = inlined_call_operand.vmem [shape: f32[2,2,64], index: 13, kind: output, shape index: {1}]   ;;  %s2855_s14 = inlined_call_operand.hbm [shape: f32[2,2,64], index: 14, kind: output, shape index: {2}]  }
   0x1   :  { %2858 = sst [smem:[#allocation9_spill]] %s2841_s0  ;;  %v20_v0 = vstv %s2846_s5 }
   0x2   :  { %2859 = sst [smem:[#allocation10_spill]] %s2842_s1  ;;  %21 = vst [vmem:[#allocation2] sm:$0x1] %v20_v0 }
   0x3   :  { %2860 = sst [smem:[#allocation11_spill]] %s2843_s2 }
   0x4   :  { %2861 = sst [smem:[#allocation12_spill]] %s2844_s3 }
   0x5   :  { %2862 = sst [smem:[#allocation13_spill]] %s2845_s4 }
   0x6   :  { %22 = vsyncpa [#allocation4], 0 }
   0x7   :  { %24 = vsyncpa [#allocation4 + $0x1], 0 }
   0x8   :  { %25 = vsyncpa [#allocation6], 0 }
   0x9   :  { %27 = vsyncpa [#allocation6 + $0x1], 0  ;;  %s2488_s15 = smov 0   ;;  %s2490_s16 = smov 0  }
   0xa   :  { %s2492_s17 = smov 0   ;;  %s2494_s18 = smov 0  }
   0xb LB: > { %s2509_s5 = sadd.s32 4294967295, %s2396_s18   ;;  %s1986_s19 = sadd.s32 4294967294, %s2396_s18   ;;  %s2396_s18 = sphi %s2494_s18, %s2875_s18   ;;  %s2392_s17 = sphi %s2492_s17, %s2874_s17   ;;  %s2388_s16 = sphi %s2490_s16, %s2873_s16   ;;  %s2384_s15 = sphi %s2488_s15, %s2872_s15  }
   0xc   : > { %s2513_s20 = sadd.s32 1, %s2396_s18   ;;  %s297_s21 = sadd.s32 1, %s2392_s17 }
   0xd   : > { %s294_s22 = ssub.s32 %s2396_s18, %s2513_s20  ;;  %p307_p0 = scmp.ne.s32.totalorder %s2392_s17, %s2388_s16 }
   0xe   : > { %p295_p1 = scmp.eq.s32.totalorder %s294_s22, 0  ;;  %p308_p2 = scmp.eq.s32.totalorder %s2509_s5, 1 }
   0xf   : > { %p313_p3 = scmp.ne.s32.totalorder %s2388_s16, %s2384_s15  ;;  %p314_p4 = scmp.eq.s32.totalorder %s1986_s19, 1 }
  0x10   : > { %s2524_s23 = scalar_select %p295_p1, %s2392_s17, %s297_s21  }
  0x11   : > { %p2526_p5 = por %p308_p2, %p307_p0  ;;  %p2530_p6 = por %p314_p4, %p313_p3 }
  0x12   : > { %p1989_p7 = scmp.ge.s32.totalorder %s2396_s18, 1  ;;  %p426_p8 = scmp.lt.s32.totalorder %s2396_s18, 3 }
  0x14   : > { %p427_p9 = pnand %p1989_p7, %p426_p8 }
  0x15   : > { %s1992_s26 = sshll.u32 (!%p427_p9), %s2509_s5, 1  ;;  %s2865_s0 = sld [smem:[#allocation9_spill]] (!%p427_p9)  ;;  %vm575_vm0 = vcmask (!%p427_p9), 1041408   ;;  %vm568_vm1 = vcmask (!%p427_p9), 31744   ;;  %vm650_vm2 = vcmask (!%p427_p9), 261120   ;;  %v2398_v28 = vmov (!%p427_p9), 0.0  }
  0x16   : > { %430 = sbr.rel (%p427_p9) target bundleno = 3608 (0xe18), region = 68  ;;  %p482_p10 = scmp.lt.s32.totalorder (!%p427_p9), %s1992_s26, 3  ;;  %vm2399_vm3 = vmmov (!%p427_p9), 0   ;;  %vm808_vm4 = vcmask (!%p427_p9), 130048   ;;  %vm1780_vm5 = vcmask (!%p427_p9), 392192   ;;  %vm1782_vm6 = vcmask (!%p427_p9), 517120  }
  0x17   : > { %s2866_s1 = sld [smem:[#allocation10_spill]] (!%p427_p9)  ;;  %s2867_s3 = sld [smem:[#allocation12_spill]] (!%p427_p9)  ;;  %vm1608_vm7 = vcmask (!%p427_p9), 1041409  }
  0x18   : > { %s2868_s2 = sld [smem:[#allocation11_spill]] (!%p427_p9)  ;;  %s2400_s19 = smov (!%p427_p9), 96  }
  0x19   : > { %s2401_s21 = smov (!%p427_p9), 64   ;;  %s2869_s4 = sld [smem:[#allocation13_spill]] (!%p427_p9) }
  0x1a   : > { %s2407_s22 = smov (!%p427_p9), 48   ;;  %p487_p11 = scmp.lt.s32.totalorder (!%p427_p9), %s2509_s5, 1 }
  0x1d   : > { %s2877_s26 = smov (!%p482_p10, %s1992_s26), 3  ;;  %v560_v3 = vld [vmem:[%s2866_s1] sm:$0x3]  ;;  %v2239_v12 = vld [vmem:[%s2867_s3 + $0x8] sm:$0xff]  }
  0x1e   : > { %s1993_s27 = sshll.u32 %s2877_s26, 2  ;;  %2179 = vmatprep.subr.msk.bf16.mxu0 %vm575_vm0, %v560_v3  ;;  %v577_v4 = vsel %vm575_vm0, %v560_v3, 0  ;;  %v2238_v11 = vld [vmem:[%s2867_s3] sm:$0xff]  }
  0x1f   : > { %s485_s30 = scalar_lea.vmem %s2865_s0, %s1993_s27  ;;  %2082 = vmatpush3.bf16.msra.mxu0 %v577_v4  ;;  %2087 = vmatprep.subr.bf16.mxu1 %v2238_v11  ;;  %v2580_v13 = vld [vmem:[%s2868_s2] ss:$0 sm:$0xff] }
  0x20   : > { %v2540_v1 = vld [vmem:[%s485_s30] sm:$0xf]  ;;  %v2543_v2 = vld [vmem:[%s485_s30 + $0x4] sm:$0xf]  ;;  %2088 = vmatpush3.bf16.msra.mxu1 %v2238_v11  ;;  %2095 = vmatprep.subr.bf16.mxu0 %v2398_v28  ;;  %s488_s30 = scalar_select %p487_p11, %s2509_s5, 1 }
  0x21   : > { %494 = vxpose.xlu0.b32.start.end [1/1] (short) (narrow) %v2540_v1, 16  ;;  %2089 = vmatprep.subr.bf16.mxu1 %v2239_v12 }
  0x24   : > { %2090 = vmatpush3.bf16.msra.mxu1 %v2239_v12 }
  0x25   : > { %2101 = vmatprep.subr.bf16.mxu1 %v2398_v28 }
  0x26   : > { %526 = vxpose.xlu0.b32.start.end [1/1] (short) (narrow) %v2543_v2, 16 }
  0xa1   : > { %v2551_v5 = vpop.trf.xlu0 }
  0xa5   : > { %v2553_v6 = vpop.trf.xlu0 }
  0xa6   : > { %v2557_v7 = vpack.c.bf16 %v2553_v6, %v2551_v5 }
  0xa8   : > { %2083 = vmatprep.mubr.msk.bf16.mxu0 %vm568_vm1, %v2557_v7 }
  0xa9   : > { %v2561_v8 = vpop.trf.xlu0 }
  0xad   : > { %v2563_v9 = vpop.trf.xlu0 }
  0xae   : > { %v2567_v10 = vpack.c.bf16 %v2563_v9, %v2561_v8 }
  0xb0   : > { %2084 = vmatmul.mubr.msk.bf16.vlgmr.msra.gmra.mrb[0].mxu0 %vm568_vm1, %v2567_v10 }
  0xb1   : > { %2097 = vmatprep.mubr.msk.bf16.mxu0 %vm2399_vm3, %v2398_v28 }
 0x183   : > { %v2085_v14 = vpop.f32.mrb[0].mxu0 }
 0x184   : > { %v622_v15 = vadd.f32 %v2085_v14, %v2580_v13  ;;  %v613_v16 = vpop.f32.mrb[1].mxu0 }
 0x185   : > { %v614_v17 = vadd.f32 %v2580_v13, %v613_v16  ;;  %v2086_v18 = vpop.f32.mrb[2].mxu0 }
 0x186   : > { %v625_v19 = vadd.f32 %v2086_v18, %v2580_v13  ;;  %v616_v20 = vpop.f32.mrb[3].mxu0  ;;  %v630_v22 = vmax.f32 %v622_v15, 0.0  ;;  %v1007_v18 = vld [vmem:[%s2849_s8] sm:$0x3] }
 0x187   : > { %v617_v21 = vadd.f32 %v2580_v13, %v616_v20  ;;  %v628_v24 = vmax.f32 %v614_v17, 0.0 }
 0x188   : > { %v631_v23 = vmax.f32 %v625_v19, 0.0 }
 0x189   : > { %v629_v25 = vmax.f32 %v617_v21, 0.0 }
 0x18a   : > { %v633_v26 = vpack.c.bf16 %v631_v23, %v630_v22 }
 0x18b   : > { %v632_v27 = vpack.c.bf16 %v629_v25, %v628_v24 }
 0x18d   : > { %2091 = vmatprep.mubr.msk.bf16.mxu1 %vm650_vm2, %v632_v27 }
 0x18e   : > { %2092 = vmatmul.mubr.msk.bf16.vlgmr.msra.gmra.mrb[0].mxu1 %vm650_vm2, %v633_v26 }
 0x18f   : > { %2103 = vmatprep.mubr.msk.bf16.mxu1 %vm2399_vm3, %v2398_v28 }
 0x261   : > { %v2093_v29 = vpop.f32.mrb[0].mxu1 }
 0x262   : > { %v691_v30 = vpop.f32.mrb[1].mxu1 }
 0x263   : > { %v2094_v31 = vpop.f32.mrb[2].mxu1 }
 0x264   : > { %v2594_v32 = vpack.c.bf16 %v2094_v31, %v2093_v29  ;;  %v694_v33 = vpop.f32.mrb[3].mxu1 }
 0x265   : > { %v706_v34 = vpack.c.bf16 %v694_v33, %v691_v30 }
 0x267   : > { %709 = vrot.lane.b32.xlu1 %v706_v34, %s2400_s19 }
 0x26b   : > { %759 = vrot.lane.b32.xlu1 %v2594_v32, %s2400_s19 }
 0x2d9   : > { %v710_v35 = vpop.permute.xlu1 %709 }
 0x2da   : > { %v715_v36 = vsel %vm650_vm2, %v710_v35, 0 }
 0x2db   : > { %2096 = vmatpush3.bf16.xpose.msra.mxu0 %v715_v36 }
 0x2dc   : > { %2107 = vmatprep.subr.bf16.mxu0 %v2398_v28 }
 0x2dd   : > { %v760_v37 = vpop.permute.xlu1 %759 }
 0x2de   : > { %v765_v38 = vsel %vm650_vm2, %v760_v37, 0 }
 0x2df   : > { %2102 = vmatpush3.bf16.xpose.msra.mxu1 %v765_v38 }
 0x2e0   : > { %2113 = vmatprep.subr.bf16.mxu1 %v2398_v28 }
 0x2e2   : > { %2098 = vmatmul.mubr.msk.bf16.vlgmr.msra.gmra.mrb[4].mxu0 %vm650_vm2, %v706_v34 }
 0x2e3   : > { %2109 = vmatprep.mubr.msk.bf16.mxu0 %vm2399_vm3, %v2398_v28 }
 0x2e6   : > { %2104 = vmatmul.mubr.msk.bf16.vlgmr.msra.gmra.mrb[4].mxu1 %vm650_vm2, %v2594_v32 }
 0x2e7   : > { %2115 = vmatprep.mubr.msk.bf16.mxu1 %vm2399_vm3, %v2398_v28 }
 0x3b5   : > { %v751_v39 = vpop.f32.mrb[4].mxu0 }
 0x3b6   : > { %v2099_v40 = vpop.f32.mrb[5].mxu0  ;;  %v809_v41 = vsel %vm808_vm4, %v751_v39, -inf }
 0x3b7   : > { %810 = vmax.xlane.f32.xlu1 %v809_v41  ;;  %v754_v42 = vpop.f32.mrb[6].mxu0 }
 0x3b8   : > { %v2100_v43 = vpop.f32.mrb[7].mxu0  ;;  %v812_v44 = vsel %vm808_vm4, %v754_v42, -inf }
 0x3b9   : > { %813 = vmax.xlane.f32.xlu0 %v812_v44  ;;  %v801_v45 = vpop.f32.mrb[4].mxu1 }
 0x3ba   : > { %v2105_v46 = vpop.f32.mrb[5].mxu1  ;;  %v815_v47 = vsel %vm808_vm4, %v801_v45, -inf }
 0x3bb   : > { %816 = vmax.xlane.f32.xlu1 %v815_v47  ;;  %v804_v48 = vpop.f32.mrb[6].mxu1 }
 0x3bc   : > { %v2106_v49 = vpop.f32.mrb[7].mxu1  ;;  %v818_v50 = vsel %vm808_vm4, %v804_v48, -inf }
 0x3bf   : > { %819 = vmax.xlane.f32.xlu1 %v818_v50 }
 0x444   : > { %v811_v51 = vpop.xlane.xlu1 %810 }
 0x445   : > { %v821_v52 = vsub.f32 %v751_v39, %v811_v51  ;;  %v2006_v39 = vld [vmem:[%s2869_s4] ss:$0 sm:$0xff] }
 0x446   : > { %v814_v54 = vpop.xlane.xlu0 %813 }
 0x447   : > { %v825_v53 = vmul.f32 1.442695, %v821_v52  ;;  %v822_v57 = vsub.f32 %v754_v42, %v814_v54  ;;  %v2402_v54 = vmov 0  }
 0x448   : > { %v817_v55 = vpop.xlane.xlu1 %816  ;;  %2236 = vset.pattern.permute.xlu0 %v2402_v54  ;;  %2237 = vset.pattern.permute.xlu1 %v2402_v54 }
 0x449   : > { %2246 = vpow2.f32 %v825_v53  ;;  %v823_v56 = vsub.f32 %v801_v45, %v817_v55  ;;  %v827_v61 = vmul.f32 1.442695, %v822_v57  ;;  %v2007_v55 = vld [vmem:[#allocation2] ss:$0 sm:$0xff] }
 0x44b   : > { %v829_v58 = vmul.f32 1.442695, %v823_v56 }
 0x44c   : > { %v820_v59 = vpop.xlane.xlu1 %819 }
 0x44d   : > { %2248 = vpow2.f32 %v829_v58  ;;  %v824_v60 = vsub.f32 %v804_v48, %v820_v59 }
 0x44f   : > { %v831_v62 = vmul.f32 1.442695, %v824_v60 }
 0x451   : > { %2250 = vpow2.f32 %v831_v62 }
 0x452   : > { %2252 = vpow2.f32 %v827_v61 }
 0x453   : > { %v2247_v63 = vpop.eup %2246 }
 0x454   : > { %v833_v0 = vsel %vm808_vm4, %v2247_v63, 0.0 }
 0x455   : > { %834 = vadd.xlane.f32.xlu1 %v833_v0 }
 0x457   : > { %v2249_v3 = vpop.eup %2248 }
 0x458   : > { %v839_v4 = vsel %vm808_vm4, %v2249_v3, 0.0 }
 0x459   : > { %840 = vadd.xlane.f32.xlu0 %v839_v4 }
 0x45b   : > { %v2251_v11 = vpop.eup %2250 }
 0x45c   : > { %v842_v12 = vsel %vm808_vm4, %v2251_v11, 0.0  ;;  %v2253_v14 = vpop.eup %2252 }
 0x45d   : > { %843 = vadd.xlane.f32.xlu1 %v842_v12  ;;  %v836_v15 = vsel %vm808_vm4, %v2253_v14, 0.0 }
 0x461   : > { %837 = vadd.xlane.f32.xlu1 %v836_v15 }
 0x46f   : > { %855 = vrot.lane.b32.xlu0 %v706_v34, %s2401_s21  ;;  %v1016_v34 = vsel %vm575_vm0, %v1007_v18, 0 }
 0x472   : > { %902 = vrot.lane.b32.xlu1 %v2594_v32, %s2401_s21 }
 0x4e2   : > { %v835_v16 = vpop.xlane.xlu1 %834 }
 0x4e6   : > { %v841_v17 = vpop.xlane.xlu0 %840 }
 0x4e7   : > { %2254 = vrcp.f32 %v841_v17 }
 0x4ea   : > { %v856_v19 = vpop.permute.xlu0 %855  ;;  %v844_v20 = vpop.xlane.xlu1 %843 }
 0x4eb   : > { %2256 = vrcp.f32 %v844_v20  ;;  %2108 = vmatpush3.bf16.msra.mxu0 %v856_v19 }
 0x4ec   : > { %2180 = vmatprep.subr.msk.bf16.mxu0 %vm575_vm0, %v1007_v18  ;;  %2258 = vrcp.f32 %v835_v16 }
 0x4ee   : > { %v838_v21 = vpop.xlane.xlu1 %837 }
 0x4ef   : > { %2260 = vrcp.f32 %v838_v21 }
 0x4f1   : > { %v2255_v23 = vpop.eup %2254 }
 0x4f2   : > { %v903_v22 = vpop.permute.xlu1 %902  ;;  %v851_v25 = vmul.f32 %v2255_v23, %v2249_v3  ;;  %v2240_v23 = vld [vmem:[%s2851_s10] sm:$0xff]  }
 0x4f3   : > { %2114 = vmatpush3.bf16.msra.mxu1 %v903_v22 }
 0x4f4   : > { %2125 = vmatprep.subr.bf16.mxu1 %v2240_v23 }
 0x4f5   : > { %v2257_v24 = vpop.eup %2256 }
 0x4f6   : > { %v852_v26 = vmul.f32 %v2257_v24, %v2251_v11  ;;  %v2259_v27 = vpop.eup %2258 }
 0x4f7   : > { %v849_v31 = vmul.f32 %v2259_v27, %v2247_v63  ;;  %v2012_v27 = vld [vmem:[%s2850_s9] ss:$0 sm:$0xff] }
 0x4f8   : > { %v854_v29 = vpack.c.bf16 %v852_v26, %v851_v25  ;;  %v2241_v25 = vld [vmem:[%s2851_s10 + $0x8] sm:$0xff]  }
 0x4f9   : > { %v2261_v30 = vpop.eup %2260 }
 0x4fa   : > { %v850_v32 = vmul.f32 %v2261_v30, %v2253_v14  ;;  %2116 = vmatmul.mubr.msk.bf16.vlgmr.msra.gmra.mrb[8].mxu1 %vm808_vm4, %v854_v29 }
 0x4fb   : > { %2126 = vmatpush3.bf16.msra.mxu1 %v2240_v23 }
 0x4fc   : > { %v853_v33 = vpack.c.bf16 %v850_v32, %v849_v31  ;;  %2127 = vmatprep.subr.bf16.mxu1 %v2241_v25 }
 0x4fe   : > { %2110 = vmatmul.mubr.msk.bf16.vlgmr.msra.gmra.mrb[8].mxu0 %vm808_vm4, %v853_v33 }
 0x4ff   : > { %2121 = vmatprep.mubr.msk.bf16.mxu0 %vm568_vm1, %v2557_v7  ;;  %2120 = vmatpush3.bf16.msra.mxu0 %v1016_v34 }
 0x500   : > { %2128 = vmatpush3.bf16.msra.mxu1 %v2241_v25 }
 0x506   : > { %2122 = vmatmul.mubr.msk.bf16.vlgmr.msra.gmra.mrb[12].mxu0 %vm568_vm1, %v2567_v10 }
 0x5cd   : > { %v942_v35 = vpop.f32.mrb[8].mxu1 }
 0x5ce   : > { %v2117_v36 = vpop.f32.mrb[9].mxu1  ;;  %v958_v47 = vmul.f32 %v2006_v39, %v942_v35 }
 0x5cf   : > { %v945_v37 = vpop.f32.mrb[10].mxu1 }
 0x5d0   : > { %v2118_v38 = vpop.f32.mrb[11].mxu1  ;;  %v959_v44 = vmul.f32 %v2006_v39, %v945_v37  ;;  %v966_v51 = vsel %vm650_vm2, %v958_v47, 0.0 }
 0x5d1   : > { %v895_v40 = vpop.f32.mrb[8].mxu0 }
 0x5d2   : > { %v956_v41 = vmul.f32 %v2006_v39, %v895_v40  ;;  %v2111_v42 = vpop.f32.mrb[9].mxu0  ;;  %v969_v48 = vsel %vm650_vm2, %v959_v44, 0.0 }
 0x5d3   : > { %v898_v43 = vpop.f32.mrb[10].mxu0 }
 0x5d4   : > { %v957_v45 = vmul.f32 %v2006_v39, %v898_v43  ;;  %v2112_v46 = vpop.f32.mrb[11].mxu0  ;;  %v960_v7 = vsel %vm650_vm2, %v956_v41, 0.0 }
 0x5d5   : > { %961 = vadd.xlane.f32.xlu1 %v960_v7  ;;  %v1185_v7 = vld [vmem:[%s2866_s1] sm:$0x3]  ;;  %s2408_s1 = smov [#allocation5]  }
 0x5d6   : > { %v963_v10 = vsel %vm650_vm2, %v957_v45, 0.0  ;;  %2181 = vmatprep.subr.msk.bf16.mxu0 %vm575_vm0, %v1185_v7  ;;  %v1200_v47 = vsel %vm575_vm0, %v1185_v7, 0  ;;  %s2306_s2 = sshll.u32 %s2408_s1, 4  ;;  %s2307_s2 = int_to_ptr.vmem [resolvable:$false] %s2306_s2 }
 0x5d7   : > { %964 = vadd.xlane.f32.xlu0 %v963_v10  ;;  %2134 = vmatpush3.bf16.msra.mxu0 %v1200_v47  ;;  %v2015_v10 = vld [vmem:[%s2852_s11] ss:$0 sm:$0xff] }
 0x5d8   : > { %2147 = vmatprep.subr.bf16.mxu0 %v2398_v28 }
 0x5d9   : > { %v2123_v49 = vpop.f32.mrb[12].mxu0  ;;  %970 = vadd.xlane.f32.xlu1 %v969_v48 }
 0x5da   : > { %v1052_v50 = vpop.f32.mrb[13].mxu0  ;;  %v1061_v33 = vadd.f32 %v2123_v49, %v2012_v27 }
 0x5db   : > { %v2124_v52 = vpop.f32.mrb[14].mxu0  ;;  %967 = vadd.xlane.f32.xlu0 %v966_v51  ;;  %v1053_v29 = vadd.f32 %v2012_v27, %v1052_v50 }
 0x5dc   : > { %v1055_v53 = vpop.f32.mrb[15].mxu0  ;;  %v1064_v35 = vadd.f32 %v2124_v52, %v2012_v27  ;;  %v1069_v40 = vmax.f32 %v1061_v33, 0.0 }
 0x5dd   : > { %v1056_v30 = vadd.f32 %v2012_v27, %v1055_v53  ;;  %v1067_v34 = vmax.f32 %v1053_v29, 0.0 }
 0x5de   : > { %v1070_v41 = vmax.f32 %v1064_v35, 0.0 }
 0x5df   : > { %v1068_v36 = vmax.f32 %v1056_v30, 0.0 }
 0x662   : > { %v962_v56 = vpop.xlane.xlu1 %961 }
 0x663   : > { %v979_v57 = vadd.f32 %v2007_v55, %v962_v56 }
 0x664   : > { %v965_v58 = vpop.xlane.xlu0 %964 }
 0x665   : > { %v2008_v59 = vmul.f32 -1.442695, %v979_v57  ;;  %v980_v60 = vadd.f32 %v2007_v55, %v965_v58 }
 0x666   : > { %v971_v61 = vpop.xlane.xlu1 %970 }
 0x667   : > { %2262 = vpow2.f32 %v2008_v59  ;;  %v2009_v62 = vmul.f32 -1.442695, %v980_v60  ;;  %v982_v0 = vadd.f32 %v2007_v55, %v971_v61 }
 0x668   : > { %v968_v63 = vpop.xlane.xlu0 %967 }
 0x669   : > { %v981_v3 = vadd.f32 %v2007_v55, %v968_v63  ;;  %2264 = vpow2.f32 %v2009_v62  ;;  %v2011_v11 = vmul.f32 -1.442695, %v982_v0 }
 0x66b   : > { %v2010_v4 = vmul.f32 -1.442695, %v981_v3 }
 0x66d   : > { %2266 = vpow2.f32 %v2010_v4 }
 0x66e   : > { %2268 = vpow2.f32 %v2011_v11 }
 0x671   : > { %v2263_v12 = vpop.eup %2262 }
 0x672   : > { %v995_v14 = vadd.f32 1.0, %v2263_v12 }
 0x673   : > { %v2265_v15 = vpop.eup %2264 }
 0x674   : > { %2270 = vrcp.f32 %v995_v14  ;;  %v996_v18 = vadd.f32 1.0, %v2265_v15 }
 0x677   : > { %v2267_v16 = vpop.eup %2266 }
 0x678   : > { %v997_v17 = vadd.f32 1.0, %v2267_v16  ;;  %v2269_v19 = vpop.eup %2268 }
 0x679   : > { %v998_v21 = vadd.f32 1.0, %v2269_v19 }
 0x67a   : > { %2272 = vrcp.f32 %v997_v17 }
 0x67b   : > { %2274 = vrcp.f32 %v996_v18 }
 0x67c   : > { %2276 = vrcp.f32 %v998_v21 }
 0x67e   : > { %v2271_v20 = vpop.eup %2270 }
 0x67f   : > { %1073 = vperm.xlu0 %2236, %v2271_v20  }
 0x684   : > { %v2273_v22 = vpop.eup %2272 }
 0x685   : > { %1083 = vperm.xlu1 %2237, %v2273_v22   ;;  %v2275_v24 = vpop.eup %2274 }
 0x686   : > { %v2277_v26 = vpop.eup %2276 }
 0x689   : > { %1078 = vperm.xlu1 %2237, %v2275_v24  }
 0x68d   : > { %1088 = vperm.xlu1 %2237, %v2277_v26  }
 0x6fe   : > { %v1074_v32 = vpop.permute.xlu0 %1073 }
 0x6ff   : > { %v1091_v38 = vmul.f32 %v1074_v32, %v1067_v34 }
 0x704   : > { %v1084_v31 = vpop.permute.xlu1 %1083 }
 0x705   : > { %v1093_v44 = vmul.f32 %v1084_v31, %v1069_v40 }
 0x708   : > { %v1079_v37 = vpop.permute.xlu1 %1078 }
 0x709   : > { %v1092_v39 = vmul.f32 %v1079_v37, %v1068_v36 }
 0x70b   : > { %v1095_v42 = vpack.c.bf16 %v1092_v39, %v1091_v38 }
 0x70c   : > { %v1089_v43 = vpop.permute.xlu1 %1088 }
 0x70d   : > { %v1094_v45 = vmul.f32 %v1089_v43, %v1070_v41  ;;  %2129 = vmatprep.mubr.msk.bf16.mxu1 %vm650_vm2, %v1095_v42 }
 0x70f   : > { %v1096_v46 = vpack.c.bf16 %v1094_v45, %v1093_v44 }
 0x711   : > { %2130 = vmatmul.mubr.msk.bf16.vlgmr.msra.gmra.mrb[12].mxu1 %vm650_vm2, %v1096_v46 }
 0x7e4   : > { %v2131_v48 = vpop.f32.mrb[12].mxu1 }
 0x7e5   : > { %v1169_v49 = vadd.f32 %v2131_v48, %v2015_v10  ;;  %v1160_v50 = vpop.f32.mrb[13].mxu1 }
 0x7e6   : > { %v1161_v51 = vadd.f32 %v2015_v10, %v1160_v50  ;;  %v2132_v52 = vpop.f32.mrb[14].mxu1 }
 0x7e7   : > { %2278 = vtanh.f32 %v1169_v49  ;;  %v1172_v53 = vadd.f32 %v2132_v52, %v2015_v10  ;;  %v1163_v54 = vpop.f32.mrb[15].mxu1 }
 0x7e8   : > { %2280 = vtanh.f32 %v1161_v51  ;;  %v1164_v55 = vadd.f32 %v2015_v10, %v1163_v54 }
 0x7e9   : > { %2282 = vtanh.f32 %v1172_v53 }
 0x7ea   : > { %2284 = vtanh.f32 %v1164_v55 }
 0x7f1   : > { %v2659_v56 = vpop.eup %2278 }
 0x7f2   : > { %v2661_v57 = vpop.eup %2280  ;;  %v1181_v63 = vadd.f32 %v2659_v56, %v2561_v8 }
 0x7f3   : > { %v2663_v58 = vpop.eup %2282  ;;  %v1179_v61 = vadd.f32 %v2661_v57, %v2551_v5  ;;  %v2243_v5 = vld [vmem:[%s2867_s3 + $0x8] sm:$0xff]  }
 0x7f4   : > { %v2665_v59 = vpop.eup %2284  ;;  %v1182_v60 = vadd.f32 %v2663_v58, %v2563_v9  ;;  %v2242_v9 = vld [vmem:[%s2867_s3] sm:$0xff]   ;;  %s2308_s3 = scalar_lea.vmem %s2307_s2, 64 }
 0x7f5   : > { %v1180_v62 = vadd.f32 %v2665_v59, %v2553_v6  ;;  %2139 = vmatprep.subr.bf16.mxu1 %v2242_v9 }
 0x7f6   : > { %v1184_v3 = vpack.c.bf16 %v1182_v60, %v1181_v63  ;;  %2140 = vmatpush3.bf16.msra.mxu1 %v2242_v9 }
 0x7f7   : > { %v1183_v0 = vpack.c.bf16 %v1180_v62, %v1179_v61  ;;  %2141 = vmatprep.subr.bf16.mxu1 %v2243_v5 }
 0x7f9   : > { %2135 = vmatprep.mubr.msk.bf16.mxu0 %vm568_vm1, %v1183_v0 }
 0x7fa   : > { %2136 = vmatmul.mubr.msk.bf16.vlgmr.msra.gmra.mrb[16].mxu0 %vm568_vm1, %v1184_v3  ;;  %2142 = vmatpush3.bf16.msra.mxu1 %v2243_v5 }
 0x7fb   : > { %2149 = vmatprep.mubr.msk.bf16.mxu0 %vm2399_vm3, %v2398_v28  ;;  %2153 = vmatprep.subr.bf16.mxu1 %v2398_v28 }
 0x8cd   : > { %v2137_v6 = vpop.f32.mrb[16].mxu0 }
 0x8ce   : > { %v1245_v8 = vadd.f32 %v2137_v6, %v2580_v13  ;;  %v1236_v4 = vpop.f32.mrb[17].mxu0 }
 0x8cf   : > { %v1237_v11 = vadd.f32 %v2580_v13, %v1236_v4  ;;  %v2138_v12 = vpop.f32.mrb[18].mxu0 }
 0x8d0   : > { %v1248_v14 = vadd.f32 %v2138_v12, %v2580_v13  ;;  %v1239_v15 = vpop.f32.mrb[19].mxu0  ;;  %v1253_v17 = vmax.f32 %v1245_v8, 0.0 }
 0x8d1   : > { %v1240_v16 = vadd.f32 %v2580_v13, %v1239_v15  ;;  %v1251_v19 = vmax.f32 %v1237_v11, 0.0 }
 0x8d2   : > { %v1254_v18 = vmax.f32 %v1248_v14, 0.0 }
 0x8d3   : > { %v1252_v20 = vmax.f32 %v1240_v16, 0.0 }
 0x8d4   : > { %v1256_v21 = vpack.c.bf16 %v1254_v18, %v1253_v17 }
 0x8d5   : > { %v1255_v22 = vpack.c.bf16 %v1252_v20, %v1251_v19  ;;  %v2403_v20 = vmov 1983009808  }
 0x8d7   : > { %2143 = vmatprep.mubr.msk.bf16.mxu1 %vm650_vm2, %v1255_v22  ;;  %v1736_v22 = vlaneseq }
 0x8d8   : > { %2144 = vmatmul.mubr.msk.bf16.vlgmr.msra.gmra.mrb[16].mxu1 %vm650_vm2, %v1256_v21  ;;  %v1734_v21 = vunpack.c.l.s4 %v2403_v20 }
 0x8d9   : > { %2155 = vmatprep.mubr.msk.bf16.mxu1 %vm2399_vm3, %v2398_v28 }
 0x9ab   : > { %v2145_v23 = vpop.f32.mrb[16].mxu1 }
 0x9ac   : > { %v1313_v24 = vpop.f32.mrb[17].mxu1 }
 0x9ad   : > { %v2146_v25 = vpop.f32.mrb[18].mxu1 }
 0x9ae   : > { %v1329_v26 = vpack.c.bf16 %v2146_v25, %v2145_v23  ;;  %v1316_v27 = vpop.f32.mrb[19].mxu1  ;;  %v1735_v23 = vunpack.c.0.s8 %v1734_v21  ;;  %v2404_v25 = vmov 1934713408  }
 0x9af   : > { %v1328_v29 = vpack.c.bf16 %v1316_v27, %v1313_v24  ;;  %v1737_v24 = vshrl.u32 %v1736_v22, 7 }
 0x9b1   : > { %1331 = vrot.lane.b32.xlu1 %v1328_v29, %s2400_s19 }
 0x9b5   : > { %1381 = vrot.lane.b32.xlu1 %v1329_v26, %s2400_s19  ;;  %s2405_s19 = smov 16  }
 0xa23   : > { %v1332_v13 = vpop.permute.xlu1 %1331 }
 0xa24   : > { %v1337_v30 = vsel %vm650_vm2, %v1332_v13, 0 }
 0xa25   : > { %2148 = vmatpush3.bf16.xpose.msra.mxu0 %v1337_v30 }
 0xa26   : > { %2159 = vmatprep.subr.bf16.mxu0 %v2398_v28 }
 0xa27   : > { %v1382_v31 = vpop.permute.xlu1 %1381 }
 0xa28   : > { %v1387_v32 = vsel %vm650_vm2, %v1382_v31, 0 }
 0xa29   : > { %2154 = vmatpush3.bf16.xpose.msra.mxu1 %v1387_v32 }
 0xa2a   : > { %2165 = vmatprep.subr.bf16.mxu1 %v2398_v28 }
 0xa2c   : > { %2150 = vmatmul.mubr.msk.bf16.vlgmr.msra.gmra.mrb[20].mxu0 %vm650_vm2, %v1328_v29 }
 0xa2d   : > { %2161 = vmatprep.mubr.msk.bf16.mxu0 %vm2399_vm3, %v2398_v28 }
 0xa30   : > { %2156 = vmatmul.mubr.msk.bf16.vlgmr.msra.gmra.mrb[20].mxu1 %vm650_vm2, %v1329_v26 }
 0xa31   : > { %2167 = vmatprep.mubr.msk.bf16.mxu1 %vm2399_vm3, %v2398_v28 }
 0xaff   : > { %v1373_v33 = vpop.f32.mrb[20].mxu0 }
 0xb00   : > { %v2151_v34 = vpop.f32.mrb[21].mxu0  ;;  %v1430_v35 = vsel %vm808_vm4, %v1373_v33, -inf }
 0xb01   : > { %1431 = vmax.xlane.f32.xlu1 %v1430_v35  ;;  %v1376_v36 = vpop.f32.mrb[22].mxu0 }
 0xb02   : > { %v2152_v37 = vpop.f32.mrb[23].mxu0  ;;  %v1433_v38 = vsel %vm808_vm4, %v1376_v36, -inf }
 0xb03   : > { %1434 = vmax.xlane.f32.xlu0 %v1433_v38  ;;  %v1423_v39 = vpop.f32.mrb[20].mxu1 }
 0xb04   : > { %v2157_v40 = vpop.f32.mrb[21].mxu1  ;;  %v1436_v41 = vsel %vm808_vm4, %v1423_v39, -inf }
 0xb05   : > { %1437 = vmax.xlane.f32.xlu1 %v1436_v41  ;;  %v1426_v42 = vpop.f32.mrb[22].mxu1 }
 0xb06   : > { %v2158_v43 = vpop.f32.mrb[23].mxu1  ;;  %v1439_v44 = vsel %vm808_vm4, %v1426_v42, -inf }
 0xb07   : > { %1440 = vmax.xlane.f32.xlu0 %v1439_v44 }
 0xb8e   : > { %v1432_v45 = vpop.xlane.xlu1 %1431 }
 0xb8f   : > { %v1442_v46 = vsub.f32 %v1373_v33, %v1432_v45 }
 0xb90   : > { %v1435_v7 = vpop.xlane.xlu0 %1434 }
 0xb91   : > { %v1443_v10 = vsub.f32 %v1376_v36, %v1435_v7  ;;  %v1446_v49 = vmul.f32 1.442695, %v1442_v46 }
 0xb92   : > { %v1438_v47 = vpop.xlane.xlu1 %1437 }
 0xb93   : > { %v1444_v48 = vsub.f32 %v1423_v39, %v1438_v47  ;;  %v1448_v53 = vmul.f32 1.442695, %v1443_v10  ;;  %v2244_v47 = vld [vmem:[%s2847_s6] sm:$0xff]   ;;  %v2245_v10 = vld [vmem:[%s2847_s6 + $0x8] sm:$0xff]  }
 0xb94   : > { %v1441_v50 = vpop.xlane.xlu0 %1440 }
 0xb95   : > { %v1450_v51 = vmul.f32 1.442695, %v1444_v48  ;;  %v1445_v52 = vsub.f32 %v1426_v42, %v1441_v50 }
 0xb97   : > { %2286 = vpow2.f32 %v1450_v51  ;;  %v1452_v54 = vmul.f32 1.442695, %v1445_v52 }
 0xb98   : > { %2288 = vpow2.f32 %v1446_v49 }
 0xb99   : > { %2290 = vpow2.f32 %v1452_v54 }
 0xb9a   : > { %2292 = vpow2.f32 %v1448_v53 }
 0xba1   : > { %v2287_v55 = vpop.eup %2286 }
 0xba2   : > { %v2289_v60 = vpop.eup %2288  ;;  %v1460_v61 = vsel %vm808_vm4, %v2287_v55, 0.0 }
 0xba3   : > { %v2291_v62 = vpop.eup %2290  ;;  %1461 = vadd.xlane.f32.xlu1 %v1460_v61  ;;  %v1454_v3 = vsel %vm808_vm4, %v2289_v60, 0.0 }
 0xba4   : > { %v1463_v63 = vsel %vm808_vm4, %v2291_v62, 0.0  ;;  %v2293_v0 = vpop.eup %2292 }
 0xba5   : > { %1464 = vadd.xlane.f32.xlu0 %v1463_v63  ;;  %v1457_v9 = vsel %vm808_vm4, %v2293_v0, 0.0 }
 0xba7   : > { %1455 = vadd.xlane.f32.xlu1 %v1454_v3 }
 0xba9   : > { %1458 = vadd.xlane.f32.xlu0 %v1457_v9 }
 0xbb8   : > { %1476 = vrot.lane.b32.xlu1 %v1328_v29, %s2401_s21  ;;  %v1738_v29 = vsub.s32 %v1735_v23, %v1737_v24 }
 0xbbf   : > { %1523 = vrot.lane.b32.xlu0 %v1329_v26, %s2401_s21  ;;  %v1751_v26 = vunpack.c.l.s4 %v2404_v25  ;;  %s2406_s21 = smov 32  }
 0xbc1   : > { %v1752_v30 = vunpack.c.0.s8 %v1751_v26 }
 0xbc3   : > { %v1755_v36 = vsub.s32 %v1752_v30, %v1737_v24 }
 0xbdd   : > { %1698 = vxpose.xlu0.b32.start [1/2] (short) (narrow) %v2659_v56, 8 }
 0xbe1   : > { %1699 = vxpose.xlu0.b32.end [2/2] (short) (narrow) %v2663_v58, 8  ;;  %1666 = vxpose.xlu1.b32.start [1/2] (short) (narrow) %v2661_v57, 8 }
 0xbe5   : > { %1667 = vxpose.xlu1.b32.end [2/2] (short) (narrow) %v2665_v59, 8 }
 0xc30   : > { %v1462_v5 = vpop.xlane.xlu1 %1461 }
 0xc31   : > { %2294 = vrcp.f32 %v1462_v5 }
 0xc32   : > { %v1465_v6 = vpop.xlane.xlu0 %1464 }
 0xc33   : > { %2296 = vrcp.f32 %v1465_v6 }
 0xc34   : > { %v1456_v8 = vpop.xlane.xlu1 %1455 }
 0xc35   : > { %2298 = vrcp.f32 %v1456_v8 }
 0xc36   : > { %v1459_v4 = vpop.xlane.xlu0 %1458 }
 0xc37   : > { %2300 = vrcp.f32 %v1459_v4 }
 0xc38   : > { %v1477_v11 = vpop.permute.xlu1 %1476 }
 0xc39   : > { %2160 = vmatpush3.bf16.msra.mxu0 %v1477_v11 }
 0xc3a   : > { %v1524_v12 = vpop.permute.xlu0 %1523  ;;  %2171 = vmatprep.subr.bf16.mxu0 %v2398_v28 }
 0xc3b   : > { %v2295_v56 = vpop.eup %2294  ;;  %2166 = vmatpush3.bf16.msra.mxu1 %v1524_v12 }
 0xc3c   : > { %v1472_v14 = vmul.f32 %v2295_v56, %v2287_v55 }
 0xc3d   : > { %v2297_v58 = vpop.eup %2296 }
 0xc3e   : > { %v1473_v57 = vmul.f32 %v2297_v58, %v2291_v62 }
 0xc3f   : > { %v2299_v15 = vpop.eup %2298 }
 0xc40   : > { %v1475_v59 = vpack.c.bf16 %v1473_v57, %v1472_v14  ;;  %v1470_v17 = vmul.f32 %v2299_v15, %v2289_v60 }
 0xc41   : > { %v2301_v16 = vpop.eup %2300 }
 0xc42   : > { %v1471_v18 = vmul.f32 %v2301_v16, %v2293_v0  ;;  %2168 = vmatmul.mubr.msk.bf16.vlgmr.msra.gmra.mrb[24].mxu1 %vm808_vm4, %v1475_v59 }
 0xc44   : > { %v1474_v19 = vpack.c.bf16 %v1471_v18, %v1470_v17 }
 0xc46   : > { %2162 = vmatmul.mubr.msk.bf16.vlgmr.msra.gmra.mrb[24].mxu0 %vm808_vm4, %v1474_v19 }
 0xc47   : > { %2175 = vmatprep.mubr.msk.bf16.mxu0 %vm2399_vm3, %v2398_v28  ;;  %2172 = vmatpush3.bf16.msra.mxu0 %v2244_v47 }
 0xc48   : > { %2173 = vmatprep.subr.bf16.mxu0 %v2398_v28 }
 0xc4b   : > { %2174 = vmatpush3.bf16.msra.mxu0 %v2245_v10 }
 0xc5d   : > { %v1714_v27 = vpop.trf.xlu0 }
 0xc5e   : > { %v1740_v13 = vadd.f32 %v1714_v27, %v2543_v2  ;;  %v1797_v33 = vrot.slane %v1714_v27, %v1738_v29 }
 0xc60   : > { %v1747_v32 = vrot.slane %v1740_v13, %v1738_v29 }
 0xc61   : > { %v1682_v31 = vpop.trf.xlu1 }
 0xc62   : > { %v1732_v34 = vadd.f32 %v1682_v31, %v2540_v1  ;;  %v1790_v35 = vrot.slane %v1682_v31, %v1738_v29 }
 0xc64   : > { %v1739_v37 = vrot.slane %v1732_v34, %v1738_v29  ;;  %v1798_v38 = vcombine.low %v1790_v35, %v1797_v33  ;;  %v1799_v41 = vcombine.high %v1790_v35, %v1797_v33 }
 0xc66   : > { %v1748_v39 = vcombine.low %v1739_v37, %v1747_v32  ;;  %v1806_v40 = vrot.slane %v1798_v38, %v1755_v36  ;;  %v1749_v2 = vcombine.high %v1739_v37, %v1747_v32  ;;  %v1813_v45 = vrot.slane %v1799_v41, %v1755_v36 }
 0xc68   : > { %v1756_v42 = vrot.slane %v1748_v39, %v1755_v36  ;;  %v1814_v43 = vcombine.high %v1806_v40, %v2398_v28  ;;  %v1763_v1 = vrot.slane %v1749_v2, %v1755_v36  ;;  %v1815_v46 = vcombine.high %v1813_v45, %v2398_v28 }
 0xc6a   : > { %v1764_v44 = vcombine.high %v1756_v42, %v2398_v28  ;;  %1817 = vrot.lane.b32.xlu0 %v1814_v43, %s2405_s19  ;;  %v1765_v7 = vcombine.high %v1763_v1, %v2398_v28 }
 0xc6c   : > { %1767 = vrot.lane.b32.xlu1 %v1764_v44, %s2405_s19  ;;  %s1994_s19 = sshll.u32 %s488_s30, 1  ;;  %s2857_s30 = sshll.u32 %s2509_s5, 5 }
 0xc6d   : > { %s490_s28 = scalar_lea.vmem %s2854_s13, %s1994_s19  ;;  %s2767_s27 = scalar_lea.hbm %s2855_s14, %s2857_s30 }
 0xc6e   : > { %1775 = vrot.lane.b32.xlu0 %v1765_v7, %s2407_s22 }
 0xc70   : > { %1821 = vrot.lane.b32.xlu1 %v1813_v45, %s2406_s21 }
 0xc74   : > { %1771 = vrot.lane.b32.xlu1 %v1763_v1, %s2406_s21  ;;  %s2744_s21 = sand.u32 1, %s2388_s16  }
 0xc78   : > { %1825 = vrot.lane.b32.xlu1 %v1815_v46, %s2407_s22  ;;  %s2856_s22 = sshll.u32 %s2744_s21, 1 }
 0xc79   : > { %s2753_s29 = scalar_lea.vmem [#allocation5], %s2856_s22  ;;  %s1842_s22 = scalar_lea.sflag [#allocation6], %s2744_s21 }
 0xcdc   : > { %v1818_v50 = vpop.permute.xlu0 %1817 }
 0xcdd   : > { %v1828_v52 = vsel %vm808_vm4, %v1806_v40, %v1818_v50 }
 0xcde   : > { %v1768_v48 = vpop.permute.xlu1 %1767 }
 0xcdf   : > { %v1778_v53 = vsel %vm808_vm4, %v1756_v42, %v1768_v48 }
 0xce0   : > { %v1776_v61 = vpop.permute.xlu0 %1775 }
 0xce2   : > { %v1822_v49 = vpop.permute.xlu1 %1821 }
 0xce3   : > { %v1829_v54 = vsel %vm650_vm2, %v1828_v52, %v1822_v49 }
 0xce6   : > { %v1772_v51 = vpop.permute.xlu1 %1771 }
 0xce7   : > { %v1779_v28 = vsel %vm650_vm2, %v1778_v53, %v1772_v51 }
 0xce8   : > { %v1781_v62 = vsel %vm1780_vm5, %v1779_v28, %v1776_v61 }
 0xce9   : > { %1783 = vst.msk [vmem:[%s490_s28] sm:$0x3] %vm1782_vm6, %v1781_v62  ;;  %s1871_s28 = sshll.u32 %s2753_s29, 4  ;;  %s1872_s28 = int_to_ptr.vmem [resolvable:$true] %s1871_s28 }
 0xcea   : > { %v1826_v55 = vpop.permute.xlu1 %1825  ;;  %s2302_s0 = scalar_lea.vmem %s1872_s28, 32  ;;  %p2309_p1 = scmp.lt.s32.totalorder %s1872_s28, %s2307_s2 }
 0xceb   : > { %v1830_v60 = vsel %vm1780_vm5, %v1829_v54, %v1826_v55  ;;  %p2303_p12 = scmp.ne.s32.totalorder %s1872_s28, %s2302_s0  ;;  %p2310_p2 = scmp.lt.s32.totalorder %s2308_s3, %s2302_s0 }
 0xcec   : > { %1831 = vst.msk [vmem:[%s2753_s29] sm:$0x3] %vm1782_vm6, %v1830_v60 }
 0xced   : > { %p2304_p13 = pnand %p2303_p12, %p2526_p5  ;;  %p2311_p3 = por %p2310_p2, %p2309_p1 }
 0xcef   : > { %p2305_p0 = pneg %p2304_p13 }
 0xcf1   : > { %p2312_p4 = pnand %p2311_p3, %p2305_p0 }
 0xd15   : > { %v1563_v63 = vpop.f32.mrb[24].mxu1 }
 0xd16   : > { %v2169_v0 = vpop.f32.mrb[25].mxu1  ;;  %v1579_v9 = vsel %vm650_vm2, %v1563_v63, 0.0 }
 0xd17   : > { %v1566_v3 = vpop.f32.mrb[26].mxu1 }
 0xd18   : > { %v1580_v5 = vsel %vm650_vm2, %v1566_v3, 0.0  ;;  %v2170_v6 = vpop.f32.mrb[27].mxu1 }
 0xd19   : > { %v1581_v8 = vadd.f32 %v1580_v5, %v1579_v9  ;;  %v1516_v4 = vpop.f32.mrb[24].mxu0 }
 0xd1a   : > { %v2163_v11 = vpop.f32.mrb[25].mxu0  ;;  %v1570_v58 = vsel %vm650_vm2, %v1516_v4, 0.0 }
 0xd1b   : > { %v1582_v12 = vrot.slane %v1581_v8, 4  ;;  %v1519_v56 = vpop.f32.mrb[26].mxu0 }
 0xd1c   : > { %v1571_v14 = vsel %vm650_vm2, %v1519_v56, 0.0  ;;  %v2164_v57 = vpop.f32.mrb[27].mxu0 }
 0xd1d   : > { %v1583_v15 = vadd.f32 %v1582_v12, %v1581_v8  ;;  %v1572_v59 = vadd.f32 %v1571_v14, %v1570_v58 }
 0xd1f   : > { %v1584_v16 = vrot.slane %v1583_v15, 2  ;;  %v1573_v17 = vrot.slane %v1572_v59, 4 }
 0xd21   : > { %v1585_v18 = vadd.f32 %v1584_v16, %v1583_v15  ;;  %v1574_v19 = vadd.f32 %v1573_v17, %v1572_v59 }
 0xd23   : > { %v1586_v20 = vrot.slane %v1585_v18, 1  ;;  %v1575_v21 = vrot.slane %v1574_v19, 2 }
 0xd25   : > { %v1587_v22 = vadd.f32 %v1586_v20, %v1585_v18  ;;  %v1576_v23 = vadd.f32 %v1575_v21, %v1574_v19 }
 0xd27   : > { %v1590_v24 = vmul.f32 0.0625, %v1587_v22  ;;  %v1577_v25 = vrot.slane %v1576_v23, 1 }
 0xd29   : > { %v1578_v26 = vadd.f32 %v1577_v25, %v1576_v23  ;;  %v1592_v27 = vpack.c.bf16 %v1590_v24, %v1590_v24 }
 0xd2b   : > { %v1589_v29 = vmul.f32 0.0625, %v1578_v26  ;;  %v1607_v30 = vunpack.c.l.b16 %v1592_v27 }
 0xd2d   : > { %v1591_v13 = vpack.c.bf16 %v1589_v29, %v1589_v29 }
 0xd2f   : > { %v1606_v31 = vunpack.c.l.b16 %v1591_v13 }
 0xd31   : > { %v1609_v32 = vsel %vm1608_vm7, %v1607_v30, %v1606_v31 }
 0xd32   : > { %v1610_v33 = vpack.c.b16 %v1609_v32, %v1609_v32 }
 0xd34   : > { %2176 = vmatmul.mubr.msk.bf16.vlgmr.msra.gmra.mrb[28].mxu0 %vm650_vm2, %v1610_v33 }
 0xd35   : > { %2315 = shalt.err (!%p2312_p4)
}
 0xd36   : > { %s2316_s29 = scalar_lea.hbm %s2767_s27, 32  ;;  %s2320_s1 = scalar_lea.hbm %s2855_s14, 64 }
 0xd37   : > { %p2317_p7 = scmp.ne.s32.totalorder %s2767_s27, %s2316_s29  ;;  %p2321_p10 = scmp.lt.u32.totalorder %s2767_s27, %s2855_s14 }
 0xd38   : > { %p2322_p11 = scmp.lt.u32.totalorder %s2320_s1, %s2316_s29  ;;  %p2324_p13 = scmp.lt.u32.totalorder %s2316_s29, %s2767_s27 }
 0xd39   : > { %p2318_p8 = pnand %p2317_p7, %p2526_p5 }
 0xd3a   : > { %p2323_p12 = por %p2322_p11, %p2321_p10 }
 0xd3b   : > { %p2319_p9 = pneg %p2318_p8 }
 0xd3c   : > { %p2325_p0 = por %p2324_p13, %p2323_p12 }
 0xd3e   : > { %p2326_p1 = pnand %p2325_p0, %p2319_p9 }
 0xd40   : > { %2329 = shalt.err (!%p2326_p1)
}
 0xd41   : > { %2183 = dma.vmem_to_hbm [thread:$0]  (%p2526_p5), %s1872_s28, 32, %s2767_s27, %s1842_s22   ;;  %v2031_v34 = vld [vmem:[%s2848_s7] ss:$0 sm:$0xff]  ;;  %vm1730_vm8 = vcmask 58368  }
 0xd42   : > { %s2870_s30 = sshll.u32 %s2744_s21, 1  ;;  %s2871_s29 = sshll.u32 %s2509_s5, 5 }
 0xd43   : > { %s467_s19 = scalar_lea.vmem [#allocation3], %s2870_s30  ;;  %s2798_s4 = scalar_lea.hbm %s2853_s12, %s2871_s29 }
 0xd44   : > { %s1855_s26 = sshll.u32 %s467_s19, 4  ;;  %s1833_s22 = scalar_lea.sflag [#allocation4], %s2744_s21  ;;  %s2800_s26 = int_to_ptr.vmem [resolvable:$true] %s1855_s26 }
 0xd45   : > { %s2330_s27 = scalar_lea.vmem %s2800_s26, 32  ;;  %s2409_s5 = smov [#allocation3]  }
 0xd46   : > { %p2331_p2 = scmp.ne.s32.totalorder %s2800_s26, %s2330_s27  ;;  %s2334_s28 = sshll.u32 %s2409_s5, 4  ;;  %s2335_s28 = int_to_ptr.vmem [resolvable:$false] %s2334_s28 }
 0xd47   : > { %s2336_s0 = scalar_lea.vmem %s2335_s28, 64  ;;  %p2337_p7 = scmp.lt.s32.totalorder %s2800_s26, %s2335_s28 }
 0xd48   : > { %p2332_p3 = pnand %p2331_p2, %p2526_p5  ;;  %p2338_p8 = scmp.lt.s32.totalorder %s2336_s0, %s2330_s27 }
 0xd4a   : > { %p2333_p4 = pneg %p2332_p3  ;;  %p2339_p9 = por %p2338_p8, %p2337_p7 }
 0xd4c   : > { %p2340_p10 = pnand %p2339_p9, %p2333_p4 }
 0xe07   : > { %v1660_v35 = vpop.f32.mrb[28].mxu0 }
 0xe08   : > { %v1661_v36 = vadd.f32 %v2031_v34, %v1660_v35  ;;  %v2177_v37 = vpop.f32.mrb[29].mxu0 }
 0xe09   : > { %v1663_v38 = vpop.f32.mrb[30].mxu0 }
 0xe0a   : > { %v2178_v39 = vpop.f32.mrb[31].mxu0  ;;  %1731 = vst.msk [vmem:[%s467_s19] sm:$0x3] %vm1730_vm8, %v1661_v36 }
 0xe0b   : > { %2343 = shalt.err (!%p2340_p10)
}
 0xe0c   : > { %s2344_s21 = scalar_lea.hbm %s2798_s4, 32  ;;  %s2348_s19 = scalar_lea.hbm %s2853_s12, 64 }
 0xe0d   : > { %p2345_p11 = scmp.ne.s32.totalorder %s2798_s4, %s2344_s21  ;;  %p2349_p0 = scmp.lt.u32.totalorder %s2798_s4, %s2853_s12 }
 0xe0e   : > { %p2350_p1 = scmp.lt.u32.totalorder %s2348_s19, %s2344_s21  ;;  %p2352_p3 = scmp.lt.u32.totalorder %s2344_s21, %s2798_s4 }
 0xe0f   : > { %p2346_p12 = pnand %p2345_p11, %p2526_p5 }
 0xe10   : > { %p2351_p2 = por %p2350_p1, %p2349_p0 }
 0xe11   : > { %p2347_p13 = pneg %p2346_p12 }
 0xe12   : > { %p2353_p4 = por %p2352_p3, %p2351_p2 }
 0xe14   : > { %p2354_p7 = pnand %p2353_p4, %p2347_p13 }
 0xe16   : > { %2357 = shalt.err (!%p2354_p7)
}
 0xe17   : > { %2182 = dma.vmem_to_hbm [thread:$0]  (%p2526_p5), %s2800_s26, 32, %s2798_s4, %s1833_s22  }
 0xe18 PF: > { %p2193_p8 = scmp.ge.s32.totalorder %s2396_s18, 2  ;;  %s1883_s2 = sand.u32 1, %s2384_s15  }
 0xe19   : > { %s1884_s27 = scalar_lea.sflag [#allocation4], %s1883_s2 }
 0xe1a   : > { %p2187_p9 = pnand %p2193_p8, %p2530_p6 }
 0xe1c   : > { %2375 = dma.done.wait (!%p2187_p9), %s1884_s27, 32  }
 0xe1d   : > { %2377 = vsyncadd (!%p2187_p9), %s1884_s27, 4294967264  ;;  %s1900_s5 = scalar_lea.sflag [#allocation6], %s1883_s2 }
 0xe1e   : > { %2379 = dma.done.wait (!%p2187_p9), %s1900_s5, 32  }
 0xe1f   : > { %2381 = vsyncadd (!%p2187_p9), %s1900_s5, 4294967264  ;;  %p30_p5 = scmp.ge.s32.totalorder %s2513_s20, 4   ;;  %s2872_s15 = smov %s2388_s16 }
 0xe20   : > { %s2873_s16 = smov %s2392_s17  ;;  %s2874_s17 = smov %s2524_s23 }
 0xe21   : > { %s2875_s18 = smov %s2513_s20  ;;  %32 = sbr.rel (!%p30_p5) target bundleno = 11 (0xb), region = 132 }
 0xe28   :  { %1905 = vsyncpa [#allocation4], 1 }
 0xe29   :  { %1907 = vsyncpa [#allocation4 + $0x1], 1 }
 0xe2a   :  { %1908 = vsyncpa [#allocation6], 1 }
 0xe2b   :  { %1910 = vsyncpa [#allocation6 + $0x1], 1 }

</bundles_post_ra>
